<compile_context>
chip_gen: v7x
topology: tpu7x:2x2x1
jax: 0.10.0
libtpu: 0.0.40
codegen_flags: <defaults>
</compile_context>

<pallas_src>
import functools
import math

import jax
import jax.numpy as jnp
from jax.experimental import pallas as pl
from jax.experimental.pallas import tpu as pltpu


# Sublane packing per dtype byte-width: row tiles must be a multiple of this
# so (row_tile, lane) blocks map onto dense native vreg tiles.
_SUBLANE_PACK = {4: 8, 2: 16, 1: 32}

# Target bytes for one input block.  ~2 MiB per buffer keeps per-step overhead
# negligible while 2x(input) + 2x(output) double-buffers stay well under the
# scoped-VMEM limit on every generation (v5e 16 MiB default, v6e 32/128 MiB,
# v7x 32/64 MiB).
_TARGET_BLOCK_BYTES = 2 * 1024 * 1024
_VMEM_LIMIT_BYTES = 32 * 1024 * 1024


def _round_up(a, b):
    return -(-a // b) * b


def _maxout_kernel(x_ref, o_ref, *, pool_size):
    # x_ref: (row_tile, lane_tile) -> o_ref: (row_tile, lane_tile // pool_size)
    x = x_ref[...]
    rows, lanes = x.shape
    npools = lanes // pool_size
    o_ref[...] = jnp.max(x.reshape(rows, npools, pool_size), axis=-1)


def _pick_tiles(rows, last, pool_size, dtype):
    """Choose (row_tile, lane_tile): ~MiB-scale blocks, TPU-tiling aligned."""
    dtype_bytes = jnp.dtype(dtype).itemsize
    packing = _SUBLANE_PACK.get(dtype_bytes, 8)

    # Only tile the lane axis when `last` alone would blow the block budget.
    # Lane tiles are multiples of 128*pool_size so pools never split and the
    # output tile stays 128-lane dense.
    lane_tile = last
    lane_unit = 128 * pool_size
    if last * packing * dtype_bytes > _TARGET_BLOCK_BYTES and last % lane_unit == 0:
        lanes_budget = max(
            lane_unit,
            (_TARGET_BLOCK_BYTES // (packing * dtype_bytes)) // lane_unit * lane_unit,
        )
        lane_tile = lane_unit
        while lane_tile * 2 <= lanes_budget and last % (lane_tile * 2) == 0:
            lane_tile *= 2

    # Rows per block: fill the byte budget, but keep >= 2 grid steps along the
    # "parallel" rows axis so both v7x TensorCores have work.
    desired = max(
        packing,
        (_TARGET_BLOCK_BYTES // (lane_tile * dtype_bytes)) // packing * packing,
    )
    two_step_cap = max(packing, _round_up(-(-rows // 2), packing))
    row_tile = max(packing, min(desired, two_step_cap))
    return row_tile, lane_tile


def maxout(x, pool_size):
    """Pallas TPU implementation of Maxout over the last dimension."""
    *lead, last = x.shape
    if last % pool_size != 0:
        raise ValueError("last dim must be divisible by pool_size")
    npools = last // pool_size

    rows = math.prod(lead) if lead else 1
    x2 = x.reshape(rows, last)

    row_tile, lane_tile = _pick_tiles(rows, last, pool_size, x.dtype)

    # Ragged rows: pad to a tile multiple; padded rows are sliced off below.
    padded_rows = _round_up(rows, row_tile)
    if padded_rows != rows:
        x2 = jnp.pad(x2, ((0, padded_rows - rows), (0, 0)))

    grid = (padded_rows // row_tile, last // lane_tile)
    out_lane_tile = lane_tile // pool_size

    out2 = pl.pallas_call(
        functools.partial(_maxout_kernel, pool_size=pool_size),
        out_shape=jax.ShapeDtypeStruct((padded_rows, npools), x.dtype),
        grid_spec=pl.GridSpec(
            grid=grid,
            in_specs=[pl.BlockSpec((row_tile, lane_tile), lambda i, j: (i, j))],
            out_specs=pl.BlockSpec((row_tile, out_lane_tile), lambda i, j: (i, j)),
        ),
        compiler_params=pltpu.CompilerParams(
            dimension_semantics=("parallel", "parallel"),
            vmem_limit_bytes=_VMEM_LIMIT_BYTES,
        ),
    )(x2)

    if padded_rows != rows:
        out2 = out2[:rows]
    return out2.reshape(*lead, npools)


if __name__ == "__main__":
    key = jax.random.PRNGKey(0)
    k1, k2 = jax.random.split(key)

    def reference(x, pool_size):
        *lead, last = x.shape
        return jnp.max(x.reshape(*lead, last // pool_size, pool_size), axis=-1)

    # Case 1: (batch=2, channels=4, spatial=16, hidden=32), pool_size=4.
    x1 = jax.random.normal(k1, (2, 4, 16, 32), dtype=jnp.float32)
    out1 = jax.block_until_ready(maxout(x1, 4))
    ref1 = reference(x1, 4)
    assert out1.shape == ref1.shape, (out1.shape, ref1.shape)
    assert out1.dtype == ref1.dtype, (out1.dtype, ref1.dtype)
    assert jnp.allclose(out1, ref1), "case 1 mismatch vs reference"

    # Case 2: ragged row count (3*5 = 15 rows -> exercises tail padding) and a
    # different pool size.
    x2 = jax.random.normal(k2, (3, 5, 64), dtype=jnp.float32)
    out2 = jax.block_until_ready(maxout(x2, 8))
    ref2 = reference(x2, 8)
    assert out2.shape == ref2.shape, (out2.shape, ref2.shape)
    assert out2.dtype == ref2.dtype, (out2.dtype, ref2.dtype)
    assert jnp.allclose(out2, ref2), "case 2 mismatch vs reference"

    print("KERNEL_OK")
</pallas_src>

<mosaic_0001>
module attributes {stable_mosaic.version = 11 : i64} {
  func.func @_maxout_kernel(%arg0: i32, %arg1: i32, %arg2: memref<64x32xf32, #tpu.memory_space<vmem>>, %arg3: memref<64x8xf32, #tpu.memory_space<vmem>>) attributes {dimension_semantics = [#tpu.dimension_semantics<parallel>, #tpu.dimension_semantics<parallel>], iteration_bounds = array<i64: 2, 1>, scalar_prefetch = 0 : i64, scratch_operands = 0 : i64, tpu.core_type = #tpu.core_type<tc>, window_params = [{transform_indices = @transform_0, window_bounds = array<i64: 64, 32>}, {transform_indices = @transform_1, window_bounds = array<i64: 64, 8>}]} {
    %c0 = arith.constant 0 : index
    %c0_0 = arith.constant 0 : index
    %0 = vector.load %arg2[%c0, %c0_0] : memref<64x32xf32, #tpu.memory_space<vmem>>, vector<64x32xf32>
    %1 = vector.shape_cast %0 : vector<64x32xf32> to vector<64x8x4xf32>
    %cst = arith.constant dense<0xFF800000> : vector<64x8xf32>
    %2 = vector.multi_reduction <maximumf>, %1, %cst [2] : vector<64x8x4xf32> to vector<64x8xf32>
    %c0_1 = arith.constant 0 : index
    %c0_2 = arith.constant 0 : index
    %3 = vector.load %arg3[%c0_1, %c0_2] : memref<64x8xf32, #tpu.memory_space<vmem>>, vector<64x8xf32>
    tpu.vector_store %arg3[%c0_1, %c0_2], %2 {strides = array<i32>} : memref<64x8xf32, #tpu.memory_space<vmem>>, vector<64x8xf32>,
    return
  }
  func.func @transform_0(%arg0: i32, %arg1: i32) -> (i32, i32) {
    %c0_i32 = arith.constant 0 : i32
    return %arg0, %arg1 : i32, i32
  }
  func.func @transform_1(%arg0: i32, %arg1: i32) -> (i32, i32) {
    %c0_i32 = arith.constant 0 : i32
    return %arg0, %arg1 : i32, i32
  }
}

</mosaic_0001>

<bundles_post_ra>
// kernel: tpu_custom_call.1
= control target key start
LH: loop header
LB: loop body
LE: loop exit
PB: predicated region body
PF: predicated region fallthrough
CT: control target
= control target key end

     0   :  { %s2183_s6 = smov 0   ;;  %s2185_s7 = smov 0   ;;  %s3431_s0 = inlined_call_operand.vmem [shape: f32[128,32], index: 0, kind: input, shape index: {}]   ;;  %s3432_s1 = inlined_call_operand.vmem [shape: f32[128,8], index: 1, kind: output, shape index: {}]  }
   0x1   :  { %s2187_s8 = smov 0  }
   0x2 LB: > { %s23_s9 = sadd.s32 1, %s2158_s7  ;;  %p2100_p0 = scmp.ge.s32.totalorder %s2162_s8, 1  ;;  %s2162_s8 = sphi %s2187_s8, %s11_s8   ;;  %s2158_s7 = sphi %s2185_s7, %s3543_s7   ;;  %s2154_s6 = sphi %s2183_s6, %s3542_s6  }
   0x3   : > { %p25_p1 = scmp.ge.s32.totalorder %s23_s9, 2  ;;  %p107_p2 = scmp.lt.s32.totalorder %s2162_s8, 3 }
   0x5   : > { %s3545_s9 = smov (%p25_p1, %s23_s9), 0  ;;  %p108_p3 = pnand %p2100_p0, %p107_p2 }
   0x7   : > { %111 = sbr.rel (%p108_p3) target bundleno = 526 (0x20e), region = 24 }
   0xe   : > { %s2101_s10 = sshll.u32 %s2154_s6, 3  ;;  %s2164_s15 = smov 124   ;;  %v2171_v36 = vmov 1983009808   ;;  %v3433_v38 = vlaneseq  ;;  %v2172_v41 = vmov 1934713408  }
   0xf   : > { %p134_p4 = scmp.lt.s32.totalorder %s2101_s10, 15  ;;  %s2165_s16 = smov 120   ;;  %v338_v37 = vunpack.c.l.s4 %v2171_v36  ;;  %v402_v42 = vunpack.c.l.s4 %v2172_v41  ;;  %vm1423_vm0 = vcmask 31744   ;;  %vm1938_vm1 = vcmask 1041409  }
  0x10   : > { %s2166_s17 = smov 116   ;;  %s2167_s18 = smov 112   ;;  %v2332_v44 = vshrl.u32 %v3433_v38, 7  ;;  %vm1940_vm2 = vcmask 1042434   ;;  %vm1942_vm3 = vcmask 1043459   ;;  %vm1944_vm4 = vcmask 1044484  }
  0x11   : > { %s3547_s10 = smov (!%p134_p4, %s2101_s10), 15  ;;  %s2168_s19 = smov 108   ;;  %v339_v43 = vunpack.c.0.s8 %v338_v37  ;;  %v403_v49 = vunpack.c.0.s8 %v402_v42  ;;  %vm1946_vm5 = vcmask 1045509   ;;  %vm1948_vm6 = vcmask 1046534  }
  0x12   : > { %s2102_s11 = sshll.u32 %s3547_s10, 3  ;;  %s2169_s20 = smov 104   ;;  %3456 = vst [vmem:[#allocation2_spill] sm:$0xff] %v2332_v44  ;;  %vm1950_vm7 = vcmask 1047559   ;;  %vm2009_vm8 = vcmask 64512  }
  0x13   : > { %s140_s14 = scalar_lea.vmem %s3431_s0, %s2102_s11  ;;  %s2170_s21 = smov 100   ;;  %v2341_v50 = vsub.s32 %v339_v43, %v2332_v44 }
  0x14   : > { %v2209_v0 = vld [vmem:[%s140_s14 + $0x10] sm:$0xff]  ;;  %v2211_v1 = vld [vmem:[%s140_s14] sm:$0xff]  ;;  %v2215_v2 = vld [vmem:[%s140_s14 + $0x18] sm:$0xff]  ;;  %s3245_s24 = scalar_lea.vmem %s3432_s1, %s2102_s11 }
  0x15   : > { %171 = vrot.lane.b32.xlu1 %v2209_v0, %s2164_s15  ;;  %167 = vrot.lane.b32.xlu0 %v2211_v1, %s2164_s15  ;;  %v2217_v3 = vld [vmem:[%s140_s14 + $0x8] sm:$0xff]  ;;  %v2223_v5 = vld [vmem:[%s140_s14 + $0x20] sm:$0xff] }
  0x16   : > { %v2221_v4 = vld [vmem:[%s140_s14 + $0x28] sm:$0xff]  ;;  %v2227_v6 = vld [vmem:[%s140_s14 + $0x38] sm:$0xff]  ;;  %v2229_v7 = vld [vmem:[%s140_s14 + $0x30] sm:$0xff] }
  0x19   : > { %173 = vrot.lane.b32.xlu1 %v2215_v2, %s2164_s15  ;;  %169 = vrot.lane.b32.xlu0 %v2217_v3, %s2164_s15 }
  0x1d   : > { %177 = vrot.lane.b32.xlu1 %v2221_v4, %s2164_s15  ;;  %175 = vrot.lane.b32.xlu0 %v2223_v5, %s2164_s15 }
  0x21   : > { %181 = vrot.lane.b32.xlu1 %v2227_v6, %s2164_s15  ;;  %179 = vrot.lane.b32.xlu0 %v2229_v7, %s2164_s15 }
  0x25   : > { %193 = vrot.lane.b32.xlu1 %v2217_v3, %s2165_s16  ;;  %191 = vrot.lane.b32.xlu0 %v2211_v1, %s2165_s16 }
  0x29   : > { %197 = vrot.lane.b32.xlu1 %v2215_v2, %s2165_s16  ;;  %195 = vrot.lane.b32.xlu0 %v2209_v0, %s2165_s16 }
  0x2d   : > { %201 = vrot.lane.b32.xlu1 %v2221_v4, %s2165_s16  ;;  %199 = vrot.lane.b32.xlu0 %v2223_v5, %s2165_s16 }
  0x31   : > { %205 = vrot.lane.b32.xlu1 %v2227_v6, %s2165_s16  ;;  %203 = vrot.lane.b32.xlu0 %v2229_v7, %s2165_s16 }
  0x35   : > { %217 = vrot.lane.b32.xlu1 %v2217_v3, %s2166_s17  ;;  %215 = vrot.lane.b32.xlu0 %v2211_v1, %s2166_s17 }
  0x39   : > { %221 = vrot.lane.b32.xlu1 %v2215_v2, %s2166_s17  ;;  %219 = vrot.lane.b32.xlu0 %v2209_v0, %s2166_s17 }
  0x3d   : > { %225 = vrot.lane.b32.xlu1 %v2221_v4, %s2166_s17  ;;  %223 = vrot.lane.b32.xlu0 %v2223_v5, %s2166_s17 }
  0x41   : > { %229 = vrot.lane.b32.xlu1 %v2227_v6, %s2166_s17  ;;  %227 = vrot.lane.b32.xlu0 %v2229_v7, %s2166_s17 }
  0x45   : > { %241 = vrot.lane.b32.xlu1 %v2217_v3, %s2167_s18  ;;  %239 = vrot.lane.b32.xlu0 %v2211_v1, %s2167_s18 }
  0x49   : > { %245 = vrot.lane.b32.xlu1 %v2215_v2, %s2167_s18  ;;  %243 = vrot.lane.b32.xlu0 %v2209_v0, %s2167_s18 }
  0x4d   : > { %249 = vrot.lane.b32.xlu1 %v2221_v4, %s2167_s18  ;;  %247 = vrot.lane.b32.xlu0 %v2223_v5, %s2167_s18 }
  0x51   : > { %253 = vrot.lane.b32.xlu1 %v2227_v6, %s2167_s18  ;;  %251 = vrot.lane.b32.xlu0 %v2229_v7, %s2167_s18 }
  0x55   : > { %265 = vrot.lane.b32.xlu1 %v2217_v3, %s2168_s19  ;;  %263 = vrot.lane.b32.xlu0 %v2211_v1, %s2168_s19 }
  0x59   : > { %269 = vrot.lane.b32.xlu1 %v2215_v2, %s2168_s19  ;;  %267 = vrot.lane.b32.xlu0 %v2209_v0, %s2168_s19 }
  0x5d   : > { %273 = vrot.lane.b32.xlu1 %v2221_v4, %s2168_s19  ;;  %271 = vrot.lane.b32.xlu0 %v2223_v5, %s2168_s19 }
  0x61   : > { %277 = vrot.lane.b32.xlu1 %v2227_v6, %s2168_s19  ;;  %275 = vrot.lane.b32.xlu0 %v2229_v7, %s2168_s19 }
  0x65   : > { %289 = vrot.lane.b32.xlu1 %v2217_v3, %s2169_s20  ;;  %287 = vrot.lane.b32.xlu0 %v2211_v1, %s2169_s20 }
  0x69   : > { %293 = vrot.lane.b32.xlu1 %v2215_v2, %s2169_s20  ;;  %291 = vrot.lane.b32.xlu0 %v2209_v0, %s2169_s20 }
  0x6d   : > { %297 = vrot.lane.b32.xlu1 %v2221_v4, %s2169_s20  ;;  %295 = vrot.lane.b32.xlu0 %v2223_v5, %s2169_s20 }
  0x71   : > { %301 = vrot.lane.b32.xlu1 %v2227_v6, %s2169_s20  ;;  %299 = vrot.lane.b32.xlu0 %v2229_v7, %s2169_s20 }
  0x75   : > { %313 = vrot.lane.b32.xlu1 %v2217_v3, %s2170_s21  ;;  %311 = vrot.lane.b32.xlu0 %v2211_v1, %s2170_s21 }
  0x79   : > { %317 = vrot.lane.b32.xlu1 %v2215_v2, %s2170_s21  ;;  %315 = vrot.lane.b32.xlu0 %v2209_v0, %s2170_s21 }
  0x7d   : > { %321 = vrot.lane.b32.xlu1 %v2221_v4, %s2170_s21  ;;  %319 = vrot.lane.b32.xlu0 %v2223_v5, %s2170_s21 }
  0x81   : > { %325 = vrot.lane.b32.xlu1 %v2227_v6, %s2170_s21  ;;  %323 = vrot.lane.b32.xlu0 %v2229_v7, %s2170_s21 }
  0x87   : > { %v2281_v8 = vpop.permute.xlu1 %171  ;;  %v2283_v9 = vpop.permute.xlu0 %167 }
  0x8b   : > { %v2285_v10 = vpop.permute.xlu1 %173  ;;  %v2287_v11 = vpop.permute.xlu0 %169 }
  0x8f   : > { %v2289_v12 = vpop.permute.xlu1 %177  ;;  %v2291_v13 = vpop.permute.xlu0 %175 }
  0x93   : > { %v2293_v14 = vpop.permute.xlu1 %181  ;;  %v2295_v15 = vpop.permute.xlu0 %179 }
  0x97   : > { %v194_v16 = vpop.permute.xlu1 %193  ;;  %v192_v17 = vpop.permute.xlu0 %191 }
  0x98   : > { %v471_v47 = vcombine.low %v2217_v3, %v194_v16  ;;  %v472_v48 = vcombine.high %v2217_v3, %v194_v16  ;;  %v335_v51 = vcombine.low %v2211_v1, %v192_v17  ;;  %v336_v52 = vcombine.high %v2211_v1, %v192_v17 }
  0x99   : > { %v2364_v1 = vsub.s32 %v403_v49, %v2332_v44 }
  0x9a   : > { %v2356_v61 = vrot.slane %v471_v47, %v2341_v50  ;;  %v2359_v62 = vrot.slane %v472_v48, %v2341_v50 }
  0x9b   : > { %v198_v18 = vpop.permute.xlu1 %197  ;;  %v196_v19 = vpop.permute.xlu0 %195 }
  0x9c   : > { %v743_v53 = vcombine.low %v2215_v2, %v198_v18  ;;  %v744_v54 = vcombine.high %v2215_v2, %v198_v18  ;;  %v607_v57 = vcombine.low %v2209_v0, %v196_v19  ;;  %v608_v58 = vcombine.high %v2209_v0, %v196_v19 }
  0x9d   : > { %v343_v2 = vrot.slane %v335_v51, %v2341_v50  ;;  %v2368_v0 = vrot.slane %v336_v52, %v2341_v50 }
  0x9e   : > { %v2375_v16 = vrot.slane %v743_v53, %v2341_v50  ;;  %v2378_v17 = vrot.slane %v744_v54, %v2341_v50 }
  0x9f   : > { %v2297_v20 = vpop.permute.xlu1 %201  ;;  %v2299_v21 = vpop.permute.xlu0 %199 }
  0xa0   : > { %v1015_v63 = vcombine.low %v2221_v4, %v2297_v20  ;;  %v1016_v3 = vcombine.high %v2221_v4, %v2297_v20  ;;  %v880_v18 = vcombine.high %v2223_v5, %v2299_v21  ;;  %v2389_v4 = vrot.slane %v607_v57, %v2341_v50 }
  0xa1   : > { %v2392_v20 = vrot.slane %v608_v58, %v2341_v50 }
  0xa2   : > { %v2397_v42 = vrot.slane %v1015_v63, %v2341_v50  ;;  %v2406_v47 = vrot.slane %v1016_v3, %v2341_v50 }
  0xa3   : > { %v2301_v22 = vpop.permute.xlu1 %205  ;;  %v2303_v23 = vpop.permute.xlu0 %203 }
  0xa4   : > { %v1287_v19 = vcombine.low %v2227_v6, %v2301_v22  ;;  %v1152_v49 = vcombine.high %v2229_v7, %v2303_v23 }
  0xa7   : > { %v2305_v24 = vpop.permute.xlu1 %217  ;;  %v216_v25 = vpop.permute.xlu0 %215 }
  0xa8   : > { %v351_v59 = vcombine.low %v2283_v9, %v216_v25  ;;  %v352_v60 = vcombine.high %v2283_v9, %v216_v25  ;;  %v879_v9 = vcombine.low %v2223_v5, %v2299_v21  ;;  %v1288_v5 = vcombine.high %v2227_v6, %v2301_v22 }
  0xa9   : > { %v1151_v21 = vcombine.low %v2229_v7, %v2303_v23  ;;  %v487_v43 = vcombine.low %v2287_v11, %v2305_v24  ;;  %v488_v51 = vcombine.high %v2287_v11, %v2305_v24  ;;  %v2416_v6 = vrot.slane %v880_v18, %v2341_v50 }
  0xaa   : > { %v359_v37 = vrot.slane %v351_v59, %v2341_v50  ;;  %v366_v41 = vrot.slane %v352_v60, %v2341_v50  ;;  %v2409_v48 = vrot.slane %v879_v9, %v2341_v50  ;;  %v2419_v22 = vrot.slane %v1287_v19, %v2341_v50 }
  0xab   : > { %v2307_v26 = vpop.permute.xlu1 %221  ;;  %v2309_v27 = vpop.permute.xlu0 %219  ;;  %v2435_v58 = vrot.slane %v1288_v5, %v2341_v50  ;;  %v2438_v59 = vrot.slane %v1151_v21, %v2341_v50  ;;  %v2444_v60 = vrot.slane %v1152_v49, %v2341_v50  ;;  %v502_v63 = vrot.slane %v488_v51, %v2341_v50 }
  0xac   : > { %3457 = vst [vmem:[#allocation3_spill] sm:$0xff] %v2409_v48  ;;  %v759_v52 = vcombine.low %v2285_v10, %v2307_v26  ;;  %v760_v53 = vcombine.high %v2285_v10, %v2307_v26  ;;  %v623_v7 = vcombine.low %v2281_v8, %v2309_v27  ;;  %v624_v11 = vcombine.high %v2281_v8, %v2309_v27 }
  0xad   : > { %v399_v23 = vcombine.low %v343_v2, %v359_v37  ;;  %v415_v24 = vcombine.low %v2368_v0, %v366_v41  ;;  %v495_v10 = vrot.slane %v487_v43, %v2341_v50  ;;  %v400_v27 = vcombine.high %v343_v2, %v359_v37 }
  0xae   : > { %v2450_v3 = vrot.slane %v759_v52, %v2341_v50  ;;  %v2453_v9 = vrot.slane %v760_v53, %v2341_v50  ;;  %v416_v21 = vcombine.high %v2368_v0, %v366_v41  ;;  %v631_v43 = vrot.slane %v623_v7, %v2341_v50 }
  0xaf   : > { %v2311_v28 = vpop.permute.xlu1 %225  ;;  %v2313_v29 = vpop.permute.xlu0 %223  ;;  %v2468_v2 = vrot.slane %v415_v24, %v2364_v1  ;;  %v535_v51 = vcombine.low %v2356_v61, %v495_v10  ;;  %v536_v0 = vcombine.high %v2356_v61, %v495_v10  ;;  %v2485_v7 = vrot.slane %v400_v27, %v2364_v1 }
  0xb0   : > { %v1031_v26 = vcombine.low %v2289_v12, %v2311_v28  ;;  %v1032_v8 = vcombine.high %v2289_v12, %v2311_v28  ;;  %v896_v18 = vcombine.high %v2291_v13, %v2313_v29  ;;  %v638_v12 = vrot.slane %v624_v11, %v2341_v50 }
  0xb1   : > { %v2465_v28 = vrot.slane %v399_v23, %v2364_v1  ;;  %v895_v49 = vcombine.low %v2291_v13, %v2313_v29  ;;  %v2499_v24 = vrot.slane %v416_v21, %v2364_v1  ;;  %v551_v10 = vcombine.low %v2359_v62, %v502_v63 }
  0xb2   : > { %v2471_v37 = vrot.slane %v1031_v26, %v2341_v50  ;;  %v2478_v41 = vrot.slane %v1032_v8, %v2341_v50  ;;  %v2488_v11 = vrot.slane %v896_v18, %v2341_v50  ;;  %v552_v26 = vcombine.high %v2359_v62, %v502_v63 }
  0xb3   : > { %v2315_v30 = vpop.permute.xlu1 %229  ;;  %v2317_v31 = vpop.permute.xlu0 %227  ;;  %v2513_v8 = vrot.slane %v535_v51, %v2364_v1  ;;  %v2516_v27 = vrot.slane %v536_v0, %v2364_v1  ;;  %v687_v51 = vcombine.low %v2392_v20, %v638_v12 }
  0xb4   : > { %3458 = vst [vmem:[#allocation4_spill] sm:$0xff] %v2478_v41  ;;  %v1303_v52 = vcombine.low %v2293_v14, %v2315_v30  ;;  %v1304_v53 = vcombine.high %v2293_v14, %v2315_v30  ;;  %v1167_v13 = vcombine.low %v2295_v15, %v2317_v31  ;;  %v1168_v29 = vcombine.high %v2295_v15, %v2317_v31 }
  0xb5   : > { %v1079_v15 = vcombine.low %v2397_v42, %v2471_v37  ;;  %v2510_v31 = vrot.slane %v895_v49, %v2341_v50  ;;  %3460 = vst [vmem:[#allocation6_spill] sm:$0xff] %v2516_v27  ;;  %v1080_v18 = vcombine.high %v2397_v42, %v2471_v37  ;;  %v1095_v21 = vcombine.low %v2406_v47, %v2478_v41 }
  0xb6   : > { %v1311_v62 = vrot.slane %v1303_v52, %v2341_v50  ;;  %v2524_v63 = vrot.slane %v1304_v53, %v2341_v50  ;;  %v2531_v0 = vrot.slane %v1167_v13, %v2341_v50  ;;  %v2534_v38 = vrot.slane %v1168_v29, %v2341_v50 }
  0xb7   : > { %v2319_v32 = vpop.permute.xlu1 %241  ;;  %v2321_v33 = vpop.permute.xlu0 %239  ;;  %3459 = vst [vmem:[#allocation5_spill] sm:$0xff] %v2510_v31  ;;  %v2545_v49 = vrot.slane %v551_v10, %v2364_v1  ;;  %v671_v30 = vcombine.low %v2389_v4, %v631_v43  ;;  %v2549_v13 = vrot.slane %v552_v26, %v2364_v1  ;;  %v672_v29 = vcombine.high %v2389_v4, %v631_v43 }
  0xb8   : > { %v688_v14 = vcombine.high %v2392_v20, %v638_v12  ;;  %v1351_v44 = vcombine.low %v2419_v22, %v1311_v62  ;;  %v1352_v52 = vcombine.high %v2419_v22, %v1311_v62  ;;  %v807_v4 = vcombine.low %v2375_v16, %v2450_v3 }
  0xb9   : > { %3461 = vst [vmem:[#allocation7_spill] sm:$0xff] %v2545_v49  ;;  %3462 = vst [vmem:[#allocation8_spill] sm:$0xff] %v2549_v13  ;;  %v1215_v20 = vcombine.low %v2438_v59, %v2531_v0  ;;  %v808_v22 = vcombine.high %v2375_v16, %v2450_v3  ;;  %v2573_v10 = vrot.slane %v671_v30, %v2364_v1 }
  0xba   : > { %v2576_v26 = vrot.slane %v672_v29, %v2364_v1  ;;  %v2579_v27 = vrot.slane %v687_v51, %v2364_v1  ;;  %v2582_v41 = vrot.slane %v688_v14, %v2364_v1  ;;  %v944_v16 = vcombine.high %v2409_v48, %v2510_v31 }
  0xbb   : > { %v2323_v34 = vpop.permute.xlu1 %245  ;;  %v2325_v35 = vpop.permute.xlu0 %243  ;;  %3463 = vst [vmem:[#allocation9_spill] sm:$0xff] %v2573_v10  ;;  %v2591_v30 = vrot.slane %v1079_v15, %v2364_v1  ;;  %v2594_v29 = vrot.slane %v1351_v44, %v2364_v1  ;;  %v2597_v14 = vrot.slane %v807_v4, %v2364_v1  ;;  %v2606_v10 = vrot.slane %v1080_v18, %v2364_v1 }
  0xbc   : > { %3464 = vst [vmem:[#allocation10_spill] sm:$0xff] %v2576_v26  ;;  %3465 = vst [vmem:[#allocation11_spill] sm:$0xff] %v2579_v27  ;;  %v2603_v26 = vrot.slane %v808_v22, %v2364_v1  ;;  %v2611_v44 = vrot.slane %v1352_v52, %v2364_v1  ;;  %v2622_v31 = vrot.slane %v944_v16, %v2364_v1 }
  0xbd   : > { %3466 = vst [vmem:[#allocation12_spill] sm:$0xff] %v2582_v41  ;;  %3467 = vst [vmem:[#allocation13_spill] sm:$0xff] %v2597_v14  ;;  %v2600_v41 = vrot.slane %v1215_v20, %v2364_v1  ;;  %v3472_v4 = vcombine.low %v2378_v17, %v2453_v9 }
  0xbe   : > { %3468 = vst [vmem:[#allocation14_spill] sm:$0xff] %v2603_v26  ;;  %3469 = vst [vmem:[#allocation15_spill] sm:$0xff] %v2606_v10 }
  0xbf   : > { %v2327_v39 = vpop.permute.xlu1 %249  ;;  %v2329_v40 = vpop.permute.xlu0 %247  ;;  %3470 = vst [vmem:[#allocation16_spill] sm:$0xff] %v2611_v44  ;;  %3471 = vst [vmem:[#allocation17_spill] sm:$0xff] %v2622_v31 }
  0xc3   : > { %v2334_v45 = vpop.permute.xlu1 %253  ;;  %v2336_v46 = vpop.permute.xlu0 %251 }
  0xc7   : > { %v2347_v55 = vpop.permute.xlu1 %265  ;;  %v2349_v56 = vpop.permute.xlu0 %263 }
  0xcb   : > { %v2384_v25 = vpop.permute.xlu1 %269  ;;  %v2386_v36 = vpop.permute.xlu0 %267 }
  0xcf   : > { %v2425_v54 = vpop.permute.xlu1 %273  ;;  %v2427_v57 = vpop.permute.xlu0 %271 }
  0xd3   : > { %v2457_v19 = vpop.permute.xlu1 %277  ;;  %v2459_v5 = vpop.permute.xlu0 %275 }
  0xd7   : > { %v2494_v61 = vpop.permute.xlu1 %289  ;;  %v2496_v23 = vpop.permute.xlu0 %287 }
  0xd8   : > { %v503_v3 = vcombine.low %v2319_v32, %v2494_v61  ;;  %v504_v20 = vcombine.high %v2319_v32, %v2494_v61  ;;  %v367_v22 = vcombine.low %v2321_v33, %v2496_v23  ;;  %v368_v18 = vcombine.high %v2321_v33, %v2496_v23 }
  0xd9   : > { %v2633_v32 = vrot.slane %v3472_v4, %v2364_v1  ;;  %v2636_v61 = vrot.slane %v1095_v21, %v2364_v1 }
  0xda   : > { %v2625_v48 = vrot.slane %v503_v3, %v2341_v50 }
  0xdb   : > { %v2536_v42 = vpop.permute.xlu1 %293  ;;  %v2538_v37 = vpop.permute.xlu0 %291  ;;  %3473 = vst [vmem:[#allocation18_spill] sm:$0xff] %v2633_v32  ;;  %3474 = vst [vmem:[#allocation19_spill] sm:$0xff] %v2636_v61  ;;  %v2648_v61 = vrot.slane %v504_v20, %v2341_v50 }
  0xdc   : > { %v776_v53 = vcombine.high %v2323_v34, %v2536_v42  ;;  %v639_v52 = vcombine.low %v2325_v35, %v2538_v37  ;;  %v640_v33 = vcombine.high %v2325_v35, %v2538_v37  ;;  %v375_v35 = vrot.slane %v367_v22, %v2341_v50 }
  0xdf   : > { %v298_v13 = vpop.permute.xlu1 %297  ;;  %v296_v49 = vpop.permute.xlu0 %295 }
  0xe0   : > { %v1048_v12 = vcombine.high %v2327_v39, %v298_v13  ;;  %v912_v62 = vcombine.high %v2329_v40, %v296_v49  ;;  %v1047_v23 = vcombine.low %v2327_v39, %v298_v13  ;;  %v911_v16 = vcombine.low %v2329_v40, %v296_v49 }
  0xe1   : > { %v382_v39 = vrot.slane %v368_v18, %v2341_v50  ;;  %v2657_v49 = vrot.slane %v639_v52, %v2341_v50 }
  0xe2   : > { %v2668_v13 = vrot.slane %v1048_v12, %v2341_v50 }
  0xe3   : > { %v302_v51 = vpop.permute.xlu1 %301  ;;  %v300_v27 = vpop.permute.xlu0 %299 }
  0xe4   : > { %v1320_v15 = vcombine.high %v2334_v45, %v302_v51  ;;  %v1184_v43 = vcombine.high %v2336_v46, %v300_v27  ;;  %v1319_v3 = vcombine.low %v2334_v45, %v302_v51  ;;  %v1183_v40 = vcombine.low %v2336_v46, %v300_v27 }
  0xe5   : > { %v2654_v45 = vrot.slane %v776_v53, %v2341_v50  ;;  %v2676_v51 = vrot.slane %v911_v16, %v2341_v50 }
  0xe6   : > { %v2682_v20 = vrot.slane %v1319_v3, %v2341_v50  ;;  %v2688_v12 = vrot.slane %v1320_v15, %v2341_v50  ;;  %v2694_v18 = vrot.slane %v1184_v43, %v2341_v50 }
  0xe7   : > { %v314_v44 = vpop.permute.xlu1 %313  ;;  %v312_v31 = vpop.permute.xlu0 %311 }
  0xe8   : > { %v519_v10 = vcombine.low %v2347_v55, %v314_v44  ;;  %v520_v14 = vcombine.high %v2347_v55, %v314_v44  ;;  %v383_v4 = vcombine.low %v2349_v56, %v312_v31  ;;  %v384_v21 = vcombine.high %v2349_v56, %v312_v31  ;;  %3475 = vst [vmem:[#allocation20_spill] sm:$0xff] %v2688_v12 }
  0xe9   : > { %v2662_v56 = vrot.slane %v640_v33, %v2341_v50  ;;  %v2665_v31 = vrot.slane %v1047_v23, %v2341_v50  ;;  %v2679_v44 = vrot.slane %v912_v62, %v2341_v50 }
  0xea   : > { %v391_v55 = vrot.slane %v383_v4, %v2341_v50  ;;  %v398_v37 = vrot.slane %v384_v21, %v2341_v50  ;;  %v2671_v46 = vrot.slane %v519_v10, %v2341_v50  ;;  %v2685_v22 = vrot.slane %v520_v14, %v2341_v50 }
  0xeb   : > { %v2673_v27 = vpop.permute.xlu1 %317  ;;  %v316_v53 = vpop.permute.xlu0 %315  ;;  %v2691_v10 = vrot.slane %v1183_v40, %v2341_v50 }
  0xec   : > { %v431_v52 = vcombine.low %v375_v35, %v391_v55  ;;  %v432_v33 = vcombine.high %v375_v35, %v391_v55  ;;  %v447_v62 = vcombine.low %v382_v39, %v398_v37  ;;  %v792_v23 = vcombine.high %v2384_v25, %v2673_v27 }
  0xed   : > { %v656_v16 = vcombine.high %v2386_v36, %v316_v53  ;;  %v567_v14 = vcombine.low %v2625_v48, %v2671_v46  ;;  %v448_v3 = vcombine.high %v382_v39, %v398_v37  ;;  %v655_v4 = vcombine.low %v2386_v36, %v316_v53 }
  0xee   : > { %v2707_v40 = vrot.slane %v792_v23, %v2341_v50  ;;  %v439_v32 = vrot.slane %v431_v52, %v2364_v1  ;;  %v2722_v23 = vrot.slane %v447_v62, %v2364_v1 }
  0xef   : > { %v322_v43 = vpop.permute.xlu1 %321  ;;  %v320_v21 = vpop.permute.xlu0 %319  ;;  %v2710_v55 = vrot.slane %v656_v16, %v2341_v50  ;;  %v2725_v16 = vrot.slane %v432_v33, %v2364_v1  ;;  %v2728_v52 = vrot.slane %v655_v4, %v2341_v50 }
  0xf0   : > { %v1063_v26 = vcombine.low %v2425_v54, %v322_v43  ;;  %v1064_v15 = vcombine.high %v2425_v54, %v322_v43  ;;  %v927_v39 = vcombine.low %v2427_v57, %v320_v21  ;;  %v928_v36 = vcombine.high %v2427_v57, %v320_v21 }
  0xf1   : > { %v2735_v21 = vrot.slane %v448_v3, %v2364_v1  ;;  %v464_v54 = vcombine.high %v2465_v28, %v439_v32  ;;  %v463_v3 = vcombine.low %v2465_v28, %v439_v32  ;;  %v467_v28 = vcombine.low %v2468_v2, %v2722_v23 }
  0xf2   : > { %v2738_v53 = vrot.slane %v1063_v26, %v2341_v50  ;;  %v2741_v62 = vrot.slane %v1064_v15, %v2341_v50  ;;  %v2744_v33 = vrot.slane %v927_v39, %v2341_v50  ;;  %v2747_v4 = vrot.slane %v928_v36, %v2341_v50 }
  0xf3   : > { %v326_v43 = vpop.permute.xlu1 %325  ;;  %v324_v35 = vpop.permute.xlu0 %323  ;;  %v1427_v36 = vsel %vm1423_vm0, %v464_v54, -inf  ;;  %v1424_v26 = vsel %vm1423_vm0, %v463_v3, -inf  ;;  %v703_v32 = vcombine.low %v2657_v49, %v2728_v52  ;;  %v1436_v54 = vsel %vm1423_vm0, %v467_v28, -inf }
  0xf4   : > { %v1335_v37 = vcombine.low %v2457_v19, %v326_v43  ;;  %v1336_v57 = vcombine.high %v2457_v19, %v326_v43  ;;  %1428 = vmax.xlane.f32.xlu1 %v1427_v36  ;;  %1425 = vmax.xlane.f32.xlu0 %v1424_v26  ;;  %v1199_v43 = vcombine.low %v2459_v5, %v324_v35 }
  0xf5   : > { %v1200_v19 = vcombine.high %v2459_v5, %v324_v35  ;;  %v584_v26 = vcombine.high %v2648_v61, %v2685_v22  ;;  %v465_v36 = vcombine.low %v2485_v7, %v2725_v16  ;;  %v469_v3 = vcombine.low %v2499_v24, %v2735_v21 }
  0xf6   : > { %v2770_v15 = vrot.slane %v1335_v37, %v2341_v50  ;;  %v2773_v39 = vrot.slane %v1336_v57, %v2341_v50  ;;  %v2792_v5 = vrot.slane %v1199_v43, %v2341_v50  ;;  %v575_v57 = vrot.slane %v567_v14, %v2364_v1 }
  0xf7   : > { %v2795_v35 = vrot.slane %v1200_v19, %v2341_v50  ;;  %v1430_v28 = vsel %vm1423_vm0, %v465_v36, -inf  ;;  %v466_v12 = vcombine.high %v2485_v7, %v2725_v16  ;;  %v3477_v14 = vcombine.high %v2438_v59, %v2531_v0 }
  0xf8   : > { %3476 = vst [vmem:[#allocation21_spill] sm:$0xff] %v2773_v39  ;;  %1437 = vmax.xlane.f32.xlu1 %v1436_v54  ;;  %v3478_v19 = vcombine.low %v2416_v6, %v2488_v11  ;;  %v791_v54 = vcombine.low %v2384_v25, %v2673_v27  ;;  %1431 = vmax.xlane.f32.xlu0 %v1430_v28 }
  0xf9   : > { %v2820_v43 = vrot.slane %v3477_v14, %v2364_v1  ;;  %v599_v36 = vcombine.low %v2513_v8, %v575_v57  ;;  %v3479_v7 = vcombine.low %v2435_v58, %v2524_v63  ;;  %v3480_v59 = vcombine.low %v2444_v60, %v2534_v38 }
  0xfa   : > { %v2826_v37 = vrot.slane %v3478_v19, %v2364_v1  ;;  %v1442_v19 = vsel %vm1423_vm0, %v469_v3, -inf  ;;  %v3481_v25 = vcombine.high %v2625_v48, %v2671_v46  ;;  %v3482_v28 = vcombine.low %v2648_v61, %v2685_v22  ;;  %v3484_v46 = vld [vmem:[#allocation4_spill] sm:$0xff] }
  0xfb   : > { %v2835_v16 = vrot.slane %v3479_v7, %v2364_v1  ;;  %v2841_v0 = vrot.slane %v3480_v59, %v2364_v1  ;;  %v3483_v7 = vcombine.high %v2378_v17, %v2453_v9  ;;  %v775_v59 = vcombine.low %v2323_v34, %v2536_v42 }
  0xfc   : > { %v582_v27 = vrot.slane %v3481_v25, %v2364_v1  ;;  %v591_v14 = vrot.slane %v3482_v28, %v2364_v1  ;;  %1443 = vmax.xlane.f32.xlu1 %v1442_v19  ;;  %v598_v3 = vrot.slane %v584_v26, %v2364_v1  ;;  %v711_v48 = vrot.slane %v703_v32, %v2364_v1 }
  0xfd   : > { %v2856_v39 = vrot.slane %v3483_v7, %v2364_v1  ;;  %v3485_v25 = vcombine.high %v2406_v47, %v3484_v46  ;;  %v704_v22 = vcombine.high %v2657_v49, %v2728_v52  ;;  %v1433_v17 = vsel %vm1423_vm0, %v466_v12, -inf  ;;  %v3489_v52 = vld [vmem:[#allocation7_spill] sm:$0xff] }
  0xfe   : > { %v468_v9 = vcombine.high %v2468_v2, %v2722_v23  ;;  %v3486_v34 = vcombine.high %v2416_v6, %v2488_v11  ;;  %v799_v32 = vrot.slane %v791_v54, %v2341_v50  ;;  %1434 = vmax.xlane.f32.xlu0 %v1433_v17  ;;  %v1448_v47 = vsel %vm1423_vm0, %v599_v36, -inf  ;;  %v3488_v2 = vld [vmem:[#allocation6_spill] sm:$0xff]  ;;  %v3490_v36 = vld [vmem:[#allocation8_spill] sm:$0xff] }
  0xff   : > { %v2866_v61 = vrot.slane %v3485_v25, %v2364_v1  ;;  %v470_v26 = vcombine.high %v2499_v24, %v2735_v21  ;;  %v3487_v49 = vcombine.high %v2435_v58, %v2524_v63  ;;  %v601_v23 = vcombine.low %v3488_v2, %v582_v27  ;;  %v3491_v21 = vld [vmem:[#allocation9_spill] sm:$0xff] }
 0x100   : > { %v2877_v42 = vrot.slane %v3486_v34, %v2364_v1  ;;  %v603_v6 = vcombine.low %v3489_v52, %v591_v14  ;;  %v600_v11 = vcombine.high %v2513_v8, %v575_v57  ;;  %v602_v54 = vcombine.high %v3488_v2, %v582_v27  ;;  %1449 = vmax.xlane.f32.xlu1 %v1448_v47 }
 0x101   : > { %v2887_v12 = vrot.slane %v3487_v49, %v2364_v1  ;;  %v783_v19 = vrot.slane %v775_v59, %v2341_v50  ;;  %v605_v28 = vcombine.low %v3490_v36, %v598_v3  ;;  %v604_v24 = vcombine.high %v3489_v52, %v591_v14 }
 0x102   : > { %v735_v7 = vcombine.low %v3491_v21, %v711_v48  ;;  %v1439_v58 = vsel %vm1423_vm0, %v468_v9, -inf  ;;  %v606_v63 = vcombine.high %v3490_v36, %v598_v3  ;;  %v2900_v46 = vrot.slane %v704_v22, %v2364_v1 }
 0x103   : > { %v3492_v8 = vcombine.high %v2444_v60, %v2534_v38  ;;  %v839_v50 = vcombine.low %v783_v19, %v799_v32  ;;  %v840_v27 = vcombine.high %v783_v19, %v799_v32  ;;  %1440 = vmax.xlane.f32.xlu0 %v1439_v58  ;;  %v1445_v14 = vsel %vm1423_vm0, %v470_v26, -inf  ;;  %v3494_v26 = vld [vmem:[#allocation10_spill] sm:$0xff] }
 0x104   : > { %v3493_v59 = vcombine.low %v2662_v56, %v2710_v55  ;;  %v1454_v3 = vsel %vm1423_vm0, %v601_v23, -inf  ;;  %v1460_v22 = vsel %vm1423_vm0, %v603_v6, -inf  ;;  %v1451_v17 = vsel %vm1423_vm0, %v600_v11, -inf }
 0x105   : > { %v2906_v57 = vrot.slane %v3492_v8, %v2364_v1  ;;  %v1457_v38 = vsel %vm1423_vm0, %v602_v54, -inf  ;;  %1455 = vmax.xlane.f32.xlu1 %v1454_v3  ;;  %v1466_v60 = vsel %vm1423_vm0, %v605_v28, -inf  ;;  %v1463_v9 = vsel %vm1423_vm0, %v604_v24, -inf  ;;  %v3508_v28 = vld [vmem:[#allocation15_spill] sm:$0xff]  ;;  %v3510_v3 = vld [vmem:[#allocation17_spill] sm:$0xff] }
 0x106   : > { %v2913_v25 = vrot.slane %v3493_v59, %v2364_v1  ;;  %v1472_v34 = vsel %vm1423_vm0, %v735_v7, -inf  ;;  %v736_v32 = vcombine.high %v3491_v21, %v711_v48  ;;  %v2924_v47 = vsel %vm1423_vm0, %v606_v63, -inf  ;;  %v3497_v48 = vld [vmem:[#allocation11_spill] sm:$0xff] }
 0x107   : > { %v737_v49 = vcombine.low %v3494_v26, %v2900_v46  ;;  %v3495_v2 = vcombine.high %v2662_v56, %v2710_v55  ;;  %v3496_v52 = vcombine.low %v2665_v31, %v2738_v53  ;;  %1446 = vmax.xlane.f32.xlu0 %v1445_v14  ;;  %v2943_v54 = vrot.slane %v839_v50, %v2364_v1 }
 0x108   : > { %v739_v11 = vcombine.low %v3497_v48, %v2913_v25  ;;  %v3498_v19 = vcombine.low %v2691_v10, %v2792_v5  ;;  %v3499_v55 = vcombine.low %v2682_v20, %v2770_v15  ;;  %v854_v7 = vrot.slane %v840_v27, %v2364_v1  ;;  %v3501_v27 = vld [vmem:[#allocation12_spill] sm:$0xff] }
 0x109   : > { %v2932_v23 = vrot.slane %v3495_v2, %v2364_v1  ;;  %v2938_v6 = vrot.slane %v3496_v52, %v2364_v1  ;;  %1461 = vmax.xlane.f32.xlu1 %v1460_v22  ;;  %v2965_v58 = vsel %vm1423_vm0, %v736_v32, -inf  ;;  %v3500_v63 = vcombine.low %v2676_v51, %v2744_v33  ;;  %v3502_v22 = vld [vmem:[#allocation14_spill] sm:$0xff] }
 0x10a   : > { %v2949_v56 = vrot.slane %v3498_v19, %v2364_v1  ;;  %v2955_v36 = vrot.slane %v3499_v55, %v2364_v1  ;;  %v1478_v59 = vsel %vm1423_vm0, %v737_v49, -inf  ;;  %v873_v32 = vcombine.low %v3502_v22, %v854_v7  ;;  %v3503_v19 = vld [vmem:[#allocation13_spill] sm:$0xff] }
 0x10b   : > { %v2971_v8 = vrot.slane %v3500_v63, %v2364_v1  ;;  %1452 = vmax.xlane.f32.xlu0 %v1451_v17  ;;  %v1484_v52 = vsel %vm1423_vm0, %v739_v11, -inf  ;;  %v3504_v49 = vcombine.high %v2665_v31, %v2738_v53  ;;  %v3506_v17 = vcombine.high %v2676_v51, %v2744_v33  ;;  %v3511_v33 = vld [vmem:[#allocation16_spill] sm:$0xff] }
 0x10c   : > { %v1280_v14 = vcombine.high %v2600_v41, %v2949_v56  ;;  %v1416_v2 = vcombine.high %v2594_v29, %v2955_v36  ;;  %v2994_v50 = vsel %vm1423_vm0, %v873_v32, -inf  ;;  %v3509_v53 = vcombine.high %v2691_v10, %v2792_v5 }
 0x10d   : > { %v1126_v21 = vrot.slane %v3504_v49, %v2364_v1  ;;  %v990_v11 = vrot.slane %v3506_v17, %v2364_v1  ;;  %1467 = vmax.xlane.f32.xlu1 %v1466_v60 }
 0x10e   : > { %v2987_v63 = vsel %vm1423_vm0, %v1280_v14, -inf  ;;  %v2997_v24 = vsel %vm1423_vm0, %v1416_v2, -inf  ;;  %v3507_v14 = vcombine.high %v2682_v20, %v2770_v15  ;;  %v1262_v32 = vrot.slane %v3509_v53, %v2364_v1 }
 0x10f   : > { %3505 = vst [vmem:[#allocation4_spill] sm:$0xff] %v2997_v24  ;;  %v1145_v31 = vcombine.low %v3508_v28, %v1126_v21  ;;  %v874_v2 = vcombine.high %v3502_v22, %v854_v7  ;;  %v1146_v49 = vcombine.high %v3508_v28, %v1126_v21  ;;  %v1009_v51 = vcombine.low %v3510_v3, %v990_v11 }
 0x110   : > { %v1398_v55 = vrot.slane %v3507_v14, %v2364_v1  ;;  %v1010_v24 = vcombine.high %v3510_v3, %v990_v11  ;;  %v3512_v20 = vcombine.low %v2654_v45, %v2707_v40  ;;  %1458 = vmax.xlane.f32.xlu0 %v1457_v38  ;;  %v1281_v10 = vcombine.low %v2820_v43, %v1262_v32 }
 0x111   : > { %v3022_v60 = vsel %vm1423_vm0, %v1145_v31, -inf  ;;  %v3026_v5 = vsel %vm1423_vm0, %v874_v2, -inf  ;;  %v1282_v28 = vcombine.high %v2820_v43, %v1262_v32  ;;  %v3030_v21 = vsel %vm1423_vm0, %v1009_v51, -inf  ;;  %1473 = vmax.xlane.f32.xlu1 %v1472_v34  ;;  %v3515_v43 = vld [vmem:[#allocation18_spill] sm:$0xff]  ;;  %v3518_v2 = vld [vmem:[#allocation20_spill] sm:$0xff] }
 0x112   : > { %v1417_v17 = vcombine.low %v3511_v33, %v1398_v55  ;;  %v863_v15 = vrot.slane %v3512_v20, %v2364_v1  ;;  %3513 = vst [vmem:[#allocation6_spill] sm:$0xff] %v3026_v5  ;;  %v3036_v3 = vsel %vm1423_vm0, %v1010_v24, -inf  ;;  %v3039_v38 = vsel %vm1423_vm0, %v1146_v49, -inf  ;;  %v3519_v49 = vld [vmem:[#allocation21_spill] sm:$0xff] }
 0x113   : > { %3514 = vst [vmem:[#allocation7_spill] sm:$0xff] %v3039_v38  ;;  %v3042_v22 = vsel %vm1423_vm0, %v1281_v10, -inf  ;;  %v3045_v11 = vsel %vm1423_vm0, %v1282_v28, -inf  ;;  %v1418_v31 = vcombine.high %v3511_v33, %v1398_v55  ;;  %v3516_v53 = vcombine.low %v2668_v13, %v2741_v62 }
 0x114   : > { %v3033_v7 = vsel %vm1423_vm0, %v1417_v17, -inf  ;;  %v875_v14 = vcombine.low %v3515_v43, %v863_v15  ;;  %v3517_v32 = vcombine.low %v2679_v44, %v2747_v4  ;;  %v3520_v51 = vcombine.low %v3518_v2, %v3519_v49  ;;  %1464 = vmax.xlane.f32.xlu0 %v1463_v9 }
 0x115   : > { %v1135_v24 = vrot.slane %v3516_v53, %v2364_v1  ;;  %v3521_v20 = vcombine.low %v2694_v18, %v2795_v35  ;;  %v3069_v10 = vsel %vm1423_vm0, %v1418_v31, -inf  ;;  %v876_v28 = vcombine.high %v3515_v43, %v863_v15  ;;  %1479 = vmax.xlane.f32.xlu1 %v1478_v59 }
 0x116   : > { %v999_v34 = vrot.slane %v3517_v32, %v2364_v1  ;;  %v1407_v17 = vrot.slane %v3520_v51, %v2364_v1  ;;  %v3066_v33 = vsel %vm1423_vm0, %v875_v14, -inf  ;;  %v3522_v53 = vcombine.high %v2654_v45, %v2707_v40  ;;  %v3523_v51 = vld [vmem:[#allocation19_spill] sm:$0xff] }
 0x117   : > { %v1271_v55 = vrot.slane %v3521_v20, %v2364_v1  ;;  %v1147_v38 = vcombine.low %v3523_v51, %v1135_v24  ;;  %v3082_v31 = vsel %vm1423_vm0, %v876_v28, -inf  ;;  %v1148_v43 = vcombine.high %v3523_v51, %v1135_v24 }
 0x118   : > { %v870_v32 = vrot.slane %v3522_v53, %v2364_v1  ;;  %v1011_v5 = vcombine.low %v2826_v37, %v999_v34  ;;  %v1419_v20 = vcombine.low %v2835_v16, %v1407_v17  ;;  %v1012_v14 = vcombine.high %v2826_v37, %v999_v34  ;;  %1470 = vmax.xlane.f32.xlu0 %v2924_v47 }
 0x119   : > { %v1283_v9 = vcombine.low %v2841_v0, %v1271_v55  ;;  %v1284_v15 = vcombine.high %v2841_v0, %v1271_v55  ;;  %v3087_v45 = vsel %vm1423_vm0, %v1147_v38, -inf  ;;  %v3106_v38 = vsel %vm1423_vm0, %v1148_v43, -inf  ;;  %1485 = vmax.xlane.f32.xlu1 %v1484_v52 }
 0x11a   : > { %v3090_v40 = vsel %vm1423_vm0, %v1011_v5, -inf  ;;  %v3093_v53 = vsel %vm1423_vm0, %v1419_v20, -inf  ;;  %v3100_v37 = vsel %vm1423_vm0, %v1012_v14, -inf  ;;  %v877_v5 = vcombine.low %v2856_v39, %v870_v32 }
 0x11b   : > { %v3096_v59 = vsel %vm1423_vm0, %v1283_v9, -inf  ;;  %v3103_v0 = vsel %vm1423_vm0, %v1284_v15, -inf  ;;  %v1420_v24 = vcombine.high %v2835_v16, %v1407_v17  ;;  %v3524_v34 = vcombine.high %v2668_v13, %v2741_v62 }
 0x11c   : > { %v3525_v47 = vcombine.high %v2679_v44, %v2747_v4  ;;  %v3526_v51 = vcombine.high %v3518_v2, %v3519_v49  ;;  %v3527_v9 = vcombine.low %v3501_v27, %v2932_v23  ;;  %v3127_v17 = vsel %vm1423_vm0, %v877_v5, -inf  ;;  %1476 = vmax.xlane.f32.xlu0 %v2965_v58 }
 0x11d   : > { %v1142_v55 = vrot.slane %v3524_v34, %v2364_v1  ;;  %v3528_v13 = vcombine.high %v2694_v18, %v2795_v35  ;;  %v878_v62 = vcombine.high %v2856_v39, %v870_v32  ;;  %v3135_v4 = vsel %vm1423_vm0, %v1420_v24, -inf }
 0x11e   : > { %v1006_v28 = vrot.slane %v3525_v47, %v2364_v1  ;;  %v1414_v20 = vrot.slane %v3526_v51, %v2364_v1  ;;  %v1490_v16 = vsel %vm1423_vm0, %v3527_v9, -inf  ;;  %v3530_v51 = vld [vmem:[#allocation3_spill] sm:$0xff] }
 0x11f   : > { %v1278_v44 = vrot.slane %v3528_v13, %v2364_v1  ;;  %v1149_v52 = vcombine.low %v2866_v61, %v1142_v55  ;;  %v3144_v18 = vsel %vm1423_vm0, %v878_v62, -inf  ;;  %v1150_v5 = vcombine.high %v2866_v61, %v1142_v55  ;;  %1491 = vmax.xlane.f32.xlu1 %v1490_v16  ;;  %v3531_v61 = vld [vmem:[#allocation5_spill] sm:$0xff] }
 0x120   : > { %v1013_v2 = vcombine.low %v2877_v42, %v1006_v28  ;;  %v1421_v49 = vcombine.low %v2887_v12, %v1414_v20  ;;  %v1014_v15 = vcombine.high %v2877_v42, %v1006_v28  ;;  %v1422_v34 = vcombine.high %v2887_v12, %v1414_v20 }
 0x121   : > { %v1285_v14 = vcombine.low %v2906_v57, %v1278_v44  ;;  %v1286_v39 = vcombine.high %v2906_v57, %v1278_v44  ;;  %v1562_v35 = vsel %vm1423_vm0, %v1149_v52, -inf  ;;  %v3529_v57 = vcombine.high %v3494_v26, %v2900_v46 }
 0x122   : > { %v3149_v32 = vsel %vm1423_vm0, %v1013_v2, -inf  ;;  %v1610_v43 = vsel %vm1423_vm0, %v1421_v49, -inf  ;;  %v1541_v24 = vsel %vm1423_vm0, %v1014_v15, -inf  ;;  %v740_v28 = vcombine.high %v3497_v48, %v2913_v25 }
 0x123   : > { %v1586_v58 = vsel %vm1423_vm0, %v1285_v14, -inf  ;;  %v1589_v42 = vsel %vm1423_vm0, %v1286_v39, -inf  ;;  %v1481_v47 = vsel %vm1423_vm0, %v3529_v57, -inf  ;;  %v3532_v55 = vcombine.low %v3530_v51, %v3531_v61 }
 0x124   : > { %v1565_v16 = vsel %vm1423_vm0, %v1150_v5, -inf  ;;  %1482 = vmax.xlane.f32.xlu0 %v1481_v47  ;;  %v1613_v13 = vsel %vm1423_vm0, %v1422_v34, -inf  ;;  %v3533_v12 = vcombine.low %v3503_v19, %v2943_v54  ;;  %v1487_v25 = vsel %vm1423_vm0, %v740_v28, -inf }
 0x125   : > { %v951_v9 = vrot.slane %v3532_v55, %v2364_v1  ;;  %v742_v48 = vcombine.high %v3501_v27, %v2932_v23  ;;  %v872_v44 = vcombine.high %v3503_v19, %v2943_v54  ;;  %v3534_v62 = vcombine.low %v2591_v30, %v2938_v6 }
 0x126   : > { %v1496_v46 = vsel %vm1423_vm0, %v3533_v12, -inf  ;;  %v1279_v2 = vcombine.low %v2600_v41, %v2949_v56  ;;  %v3535_v19 = vcombine.low %v2594_v29, %v2955_v36  ;;  %v3536_v41 = vcombine.high %v2591_v30, %v2938_v6  ;;  %v3538_v30 = vld [vmem:[#allocation6_spill] sm:$0xff]  ;;  %v3539_v29 = vld [vmem:[#allocation7_spill] sm:$0xff] }
 0x127   : > { %v1007_v26 = vcombine.low %v951_v9, %v2971_v8  ;;  %1497 = vmax.xlane.f32.xlu1 %v1496_v46  ;;  %v1493_v20 = vsel %vm1423_vm0, %v742_v48, -inf  ;;  %v1544_v52 = vsel %vm1423_vm0, %v3534_v62, -inf  ;;  %v1499_v23 = vsel %vm1423_vm0, %v872_v44, -inf }
 0x128   : > { %1488 = vmax.xlane.f32.xlu0 %v1487_v25  ;;  %v1008_v27 = vcombine.high %v951_v9, %v2971_v8  ;;  %v1568_v49 = vsel %vm1423_vm0, %v1279_v2, -inf  ;;  %v1592_v14 = vsel %vm1423_vm0, %v3535_v19, -inf  ;;  %v1547_v56 = vsel %vm1423_vm0, %v3536_v41, -inf  ;;  %v3537_v8 = vld [vmem:[#allocation4_spill] sm:$0xff] }
 0x129   : > { %v1520_v1 = vsel %vm1423_vm0, %v1007_v26, -inf  ;;  %v3540_v6 = vlaneseq }
 0x12a   : > { %v1523_v54 = vsel %vm1423_vm0, %v1008_v27, -inf }
 0x12b   : > { %1521 = vmax.xlane.f32.xlu1 %v1520_v1  ;;  %v1681_v36 = vand.u32 127, %v3540_v6 }
 0x12c   : > { %1494 = vmax.xlane.f32.xlu0 %v1493_v20 }
 0x12f   : > { %1545 = vmax.xlane.f32.xlu1 %v1544_v52 }
 0x130   : > { %1500 = vmax.xlane.f32.xlu0 %v1499_v23 }
 0x133   : > { %1569 = vmax.xlane.f32.xlu1 %v1568_v49 }
 0x134   : > { %1524 = vmax.xlane.f32.xlu0 %v1523_v54 }
 0x137   : > { %1593 = vmax.xlane.f32.xlu1 %v1592_v14 }
 0x138   : > { %1548 = vmax.xlane.f32.xlu0 %v1547_v56 }
 0x13b   : > { %1503 = vmax.xlane.f32.xlu1 %v2994_v50 }
 0x13c   : > { %1572 = vmax.xlane.f32.xlu0 %v2987_v63 }
 0x13f   : > { %1551 = vmax.xlane.f32.xlu1 %v3022_v60  ;;  %v3541_v60 = vld [vmem:[#allocation2_spill] sm:$0xff] }
 0x140   : > { %1596 = vmax.xlane.f32.xlu0 %v3537_v8 }
 0x143   : > { %1599 = vmax.xlane.f32.xlu1 %v3033_v7 }
 0x144   : > { %1527 = vmax.xlane.f32.xlu0 %v3030_v21  ;;  %v3226_v21 = vsub.s32 %v1681_v36, %v3541_v60 }
 0x147   : > { %1530 = vmax.xlane.f32.xlu1 %v3036_v3 }
 0x148   : > { %1575 = vmax.xlane.f32.xlu0 %v3042_v22 }
 0x14b   : > { %1578 = vmax.xlane.f32.xlu1 %v3045_v11 }
 0x14c   : > { %1506 = vmax.xlane.f32.xlu0 %v3538_v30 }
 0x14f   : > { %1509 = vmax.xlane.f32.xlu1 %v3066_v33 }
 0x150   : > { %1554 = vmax.xlane.f32.xlu0 %v3539_v29 }
 0x153   : > { %1557 = vmax.xlane.f32.xlu1 %v3087_v45 }
 0x154   : > { %1602 = vmax.xlane.f32.xlu0 %v3069_v10 }
 0x157   : > { %1605 = vmax.xlane.f32.xlu1 %v3093_v53 }
 0x158   : > { %1533 = vmax.xlane.f32.xlu0 %v3090_v40 }
 0x15b   : > { %1536 = vmax.xlane.f32.xlu1 %v3100_v37 }
 0x15c   : > { %1581 = vmax.xlane.f32.xlu0 %v3096_v59 }
 0x15f   : > { %1584 = vmax.xlane.f32.xlu1 %v3103_v0 }
 0x160   : > { %1512 = vmax.xlane.f32.xlu0 %v3082_v31 }
 0x163   : > { %1515 = vmax.xlane.f32.xlu1 %v3127_v17 }
 0x164   : > { %1560 = vmax.xlane.f32.xlu0 %v3106_v38 }
 0x167   : > { %1563 = vmax.xlane.f32.xlu1 %v1562_v35 }
 0x168   : > { %1608 = vmax.xlane.f32.xlu0 %v3135_v4 }
 0x16b   : > { %1611 = vmax.xlane.f32.xlu1 %v1610_v43 }
 0x16c   : > { %1539 = vmax.xlane.f32.xlu0 %v3149_v32 }
 0x16f   : > { %1542 = vmax.xlane.f32.xlu1 %v1541_v24 }
 0x170   : > { %1587 = vmax.xlane.f32.xlu0 %v1586_v58 }
 0x173   : > { %1590 = vmax.xlane.f32.xlu1 %v1589_v42 }
 0x174   : > { %1518 = vmax.xlane.f32.xlu0 %v3144_v18 }
 0x178   : > { %1566 = vmax.xlane.f32.xlu0 %v1565_v16 }
 0x17c   : > { %1614 = vmax.xlane.f32.xlu0 %v1613_v13 }
 0x181   : > { %v1429_v50 = vpop.xlane.xlu1 %1428  ;;  %v1426_v63 = vpop.xlane.xlu0 %1425 }
 0x182   : > { %v1689_v22 = vrot.slane %v1429_v50, %v3226_v21  ;;  %v1685_v11 = vrot.slane %v1426_v63, %v3226_v21 }
 0x184   : > { %v1939_v45 = vsel %vm1938_vm1, %v1689_v22, %v1685_v11 }
 0x185   : > { %v1438_v7 = vpop.xlane.xlu1 %1437  ;;  %v1432_v3 = vpop.xlane.xlu0 %1431 }
 0x186   : > { %v1693_v33 = vrot.slane %v1432_v3, %v3226_v21  ;;  %v1701_v0 = vrot.slane %v1438_v7, %v3226_v21 }
 0x188   : > { %v1941_v53 = vsel %vm1940_vm2, %v1693_v33, %v1939_v45 }
 0x189   : > { %v1444_v10 = vpop.xlane.xlu1 %1443 }
 0x18a   : > { %v1709_v39 = vrot.slane %v1444_v10, %v3226_v21 }
 0x18b   : > { %v1435_v31 = vpop.xlane.xlu0 %1434 }
 0x18c   : > { %v1697_v40 = vrot.slane %v1435_v31, %v3226_v21 }
 0x18d   : > { %v1450_v59 = vpop.xlane.xlu1 %1449 }
 0x18e   : > { %v1943_v37 = vsel %vm1942_vm3, %v1697_v40, %v1941_v53  ;;  %v1717_v42 = vrot.slane %v1450_v59, %v3226_v21 }
 0x18f   : > { %v1945_v4 = vsel %vm1944_vm4, %v1701_v0, %v1943_v37 }
 0x190   : > { %v1441_v38 = vpop.xlane.xlu0 %1440 }
 0x191   : > { %v1705_v17 = vrot.slane %v1441_v38, %v3226_v21 }
 0x192   : > { %v1456_v15 = vpop.xlane.xlu1 %1455 }
 0x193   : > { %v1947_v18 = vsel %vm1946_vm5, %v1705_v17, %v1945_v4  ;;  %v1725_v28 = vrot.slane %v1456_v15, %v3226_v21 }
 0x194   : > { %v1447_v35 = vpop.xlane.xlu0 %1446  ;;  %v1949_v43 = vsel %vm1948_vm6, %v1709_v39, %v1947_v18 }
 0x195   : > { %v1713_v32 = vrot.slane %v1447_v35, %v3226_v21 }
 0x196   : > { %v1462_v5 = vpop.xlane.xlu1 %1461 }
 0x197   : > { %v1951_v58 = vsel %vm1950_vm7, %v1713_v32, %v1949_v43  ;;  %v1733_v13 = vrot.slane %v1462_v5, %v3226_v21 }
 0x198   : > { %2010 = vst.msk [vmem:[%s3245_s24] sm:$0xff] %vm2009_vm8, %v1951_v58  ;;  %v1453_v24 = vpop.xlane.xlu0 %1452 }
 0x199   : > { %v1721_v34 = vrot.slane %v1453_v24, %v3226_v21 }
 0x19a   : > { %v1468_v57 = vpop.xlane.xlu1 %1467 }
 0x19b   : > { %v1952_v47 = vsel %vm1938_vm1, %v1721_v34, %v1717_v42  ;;  %v1741_v1 = vrot.slane %v1468_v57, %v3226_v21 }
 0x19c   : > { %v1953_v55 = vsel %vm1940_vm2, %v1725_v28, %v1952_v47 }
 0x19d   : > { %v1459_v51 = vpop.xlane.xlu0 %1458 }
 0x19e   : > { %v1729_v61 = vrot.slane %v1459_v51, %v3226_v21  ;;  %v1474_v9 = vpop.xlane.xlu1 %1473 }
 0x19f   : > { %v1749_v27 = vrot.slane %v1474_v9, %v3226_v21 }
 0x1a0   : > { %v1954_v16 = vsel %vm1942_vm3, %v1729_v61, %v1953_v55 }
 0x1a1   : > { %v1465_v12 = vpop.xlane.xlu0 %1464  ;;  %v1955_v26 = vsel %vm1944_vm4, %v1733_v13, %v1954_v16 }
 0x1a2   : > { %v1737_v46 = vrot.slane %v1465_v12, %v3226_v21  ;;  %v1480_v25 = vpop.xlane.xlu1 %1479 }
 0x1a3   : > { %v1757_v14 = vrot.slane %v1480_v25, %v3226_v21 }
 0x1a4   : > { %v1956_v48 = vsel %vm1946_vm5, %v1737_v46, %v1955_v26 }
 0x1a5   : > { %v1471_v20 = vpop.xlane.xlu0 %1470  ;;  %v1957_v62 = vsel %vm1948_vm6, %v1741_v1, %v1956_v48 }
 0x1a6   : > { %v1745_v44 = vrot.slane %v1471_v20, %v3226_v21  ;;  %v1486_v52 = vpop.xlane.xlu1 %1485 }
 0x1a7   : > { %v1765_v6 = vrot.slane %v1486_v52, %v3226_v21 }
 0x1a8   : > { %v1958_v2 = vsel %vm1950_vm7, %v1745_v44, %v1957_v62 }
 0x1a9   : > { %2011 = vst.msk [vmem:[%s3245_s24 + $0x8] sm:$0xff] %vm2009_vm8, %v1958_v2  ;;  %v1477_v23 = vpop.xlane.xlu0 %1476 }
 0x1aa   : > { %v1753_v49 = vrot.slane %v1477_v23, %v3226_v21 }
 0x1ac   : > { %v1492_v54 = vpop.xlane.xlu1 %1491  ;;  %v1959_v19 = vsel %vm1938_vm1, %v1753_v49, %v1749_v27 }
 0x1ad   : > { %v1960_v8 = vsel %vm1940_vm2, %v1757_v14, %v1959_v19  ;;  %v1773_v3 = vrot.slane %v1492_v54, %v3226_v21 }
 0x1b1   : > { %v1483_v41 = vpop.xlane.xlu0 %1482 }
 0x1b2   : > { %v1761_v56 = vrot.slane %v1483_v41, %v3226_v21 }
 0x1b4   : > { %v3275_v30 = vpop.xlane.xlu1 %1497  ;;  %v1961_v29 = vsel %vm1942_vm3, %v1761_v56, %v1960_v8 }
 0x1b5   : > { %v1489_v36 = vpop.xlane.xlu0 %1488  ;;  %v1962_v63 = vsel %vm1944_vm4, %v1765_v6, %v1961_v29  ;;  %v1781_v62 = vrot.slane %v3275_v30, %v3226_v21 }
 0x1b6   : > { %v1769_v50 = vrot.slane %v1489_v36, %v3226_v21 }
 0x1b8   : > { %v1522_v60 = vpop.xlane.xlu1 %1521  ;;  %v1963_v7 = vsel %vm1946_vm5, %v1769_v50, %v1962_v63 }
 0x1b9   : > { %v1495_v22 = vpop.xlane.xlu0 %1494  ;;  %v1964_v33 = vsel %vm1948_vm6, %v1773_v3, %v1963_v7  ;;  %v1813_v26 = vrot.slane %v1522_v60, %v3226_v21 }
 0x1ba   : > { %v1777_v11 = vrot.slane %v1495_v22, %v3226_v21 }
 0x1bc   : > { %v3285_v10 = vpop.xlane.xlu1 %1545  ;;  %v1965_v31 = vsel %vm1950_vm7, %v1777_v11, %v1964_v33 }
 0x1bd   : > { %2012 = vst.msk [vmem:[%s3245_s24 + $0x10] sm:$0xff] %vm2009_vm8, %v1965_v31  ;;  %v1501_v45 = vpop.xlane.xlu0 %1500  ;;  %v1845_v52 = vrot.slane %v3285_v10, %v3226_v21 }
 0x1be   : > { %v1785_v25 = vrot.slane %v1501_v45, %v3226_v21 }
 0x1c0   : > { %v1570_v40 = vpop.xlane.xlu1 %1569  ;;  %v1966_v41 = vsel %vm1938_vm1, %v1785_v25, %v1781_v62 }
 0x1c1   : > { %v1525_v53 = vpop.xlane.xlu0 %1524  ;;  %v1877_v27 = vrot.slane %v1570_v40, %v3226_v21 }
 0x1c2   : > { %v1817_v13 = vrot.slane %v1525_v53, %v3226_v21 }
 0x1c4   : > { %v3290_v59 = vpop.xlane.xlu1 %1593  ;;  %v1973_v2 = vsel %vm1938_vm1, %v1817_v13, %v1813_v26 }
 0x1c5   : > { %v1549_v37 = vpop.xlane.xlu0 %1548 }
 0x1c6   : > { %v1849_v49 = vrot.slane %v1549_v37, %v3226_v21 }
 0x1c8   : > { %v3292_v0 = vpop.xlane.xlu1 %1503  ;;  %v1980_v11 = vsel %vm1938_vm1, %v1849_v49, %v1845_v52 }
 0x1c9   : > { %v1573_v38 = vpop.xlane.xlu0 %1572  ;;  %v1789_v29 = vrot.slane %v3292_v0, %v3226_v21 }
 0x1ca   : > { %v1881_v1 = vrot.slane %v1573_v38, %v3226_v21 }
 0x1cb   : > { %v1967_v38 = vsel %vm1940_vm2, %v1789_v29, %v1966_v41 }
 0x1cc   : > { %v3294_v17 = vpop.xlane.xlu1 %1551  ;;  %v1987_v6 = vsel %vm1938_vm1, %v1881_v1, %v1877_v27  ;;  %v1909_v1 = vrot.slane %v3290_v59, %v3226_v21 }
 0x1cd   : > { %v3296_v4 = vpop.xlane.xlu0 %1596 }
 0x1d0   : > { %v3298_v15 = vpop.xlane.xlu1 %1599 }
 0x1d1   : > { %v1528_v18 = vpop.xlane.xlu0 %1527  ;;  %v1917_v25 = vrot.slane %v3298_v15, %v3226_v21 }
 0x1d2   : > { %v1821_v12 = vrot.slane %v1528_v18, %v3226_v21  ;;  %v1853_v18 = vrot.slane %v3294_v17, %v3226_v21  ;;  %v1913_v17 = vrot.slane %v3296_v4, %v3226_v21 }
 0x1d4   : > { %v1531_v39 = vpop.xlane.xlu1 %1530  ;;  %v1974_v54 = vsel %vm1940_vm2, %v1821_v12, %v1973_v2  ;;  %v1981_v4 = vsel %vm1940_vm2, %v1853_v18, %v1980_v11  ;;  %v1994_v2 = vsel %vm1938_vm1, %v1913_v17, %v1909_v1 }
 0x1d5   : > { %v1576_v35 = vpop.xlane.xlu0 %1575  ;;  %v1825_v48 = vrot.slane %v1531_v39, %v3226_v21  ;;  %v1995_v27 = vsel %vm1940_vm2, %v1917_v25, %v1994_v2 }
 0x1d6   : > { %v1885_v19 = vrot.slane %v1576_v35, %v3226_v21 }
 0x1d7   : > { %v1975_v56 = vsel %vm1942_vm3, %v1825_v48, %v1974_v54 }
 0x1d8   : > { %v1579_v32 = vpop.xlane.xlu1 %1578  ;;  %v1988_v33 = vsel %vm1940_vm2, %v1885_v19, %v1987_v6 }
 0x1d9   : > { %v1507_v43 = vpop.xlane.xlu0 %1506  ;;  %v1889_v8 = vrot.slane %v1579_v32, %v3226_v21 }
 0x1da   : > { %v1793_v60 = vrot.slane %v1507_v43, %v3226_v21 }
 0x1db   : > { %v1989_v40 = vsel %vm1942_vm3, %v1889_v8, %v1988_v33 }
 0x1dc   : > { %v3300_v5 = vpop.xlane.xlu1 %1509  ;;  %v1968_v43 = vsel %vm1942_vm3, %v1793_v60, %v1967_v38 }
 0x1dd   : > { %v3302_v58 = vpop.xlane.xlu0 %1554  ;;  %v1797_v10 = vrot.slane %v3300_v5, %v3226_v21 }
 0x1de   : > { %v1857_v5 = vrot.slane %v3302_v58, %v3226_v21 }
 0x1e0   : > { %v3304_v24 = vpop.xlane.xlu1 %1557 }
 0x1e1   : > { %v3306_v42 = vpop.xlane.xlu0 %1602 }
 0x1e4   : > { %v3308_v34 = vpop.xlane.xlu1 %1605 }
 0x1e5   : > { %v1534_v57 = vpop.xlane.xlu0 %1533  ;;  %v1925_v52 = vrot.slane %v3308_v34, %v3226_v21 }
 0x1e6   : > { %v1829_v20 = vrot.slane %v1534_v57, %v3226_v21 }
 0x1e8   : > { %v1537_v47 = vpop.xlane.xlu1 %1536  ;;  %v1976_v36 = vsel %vm1944_vm4, %v1829_v20, %v1975_v56  ;;  %v1921_v20 = vrot.slane %v3306_v42, %v3226_v21 }
 0x1e9   : > { %v1582_v28 = vpop.xlane.xlu0 %1581  ;;  %v1833_v23 = vrot.slane %v1537_v47, %v3226_v21 }
 0x1ea   : > { %v1893_v50 = vrot.slane %v1582_v28, %v3226_v21  ;;  %v1969_v28 = vsel %vm1944_vm4, %v1797_v10, %v1968_v43  ;;  %v1996_v54 = vsel %vm1942_vm3, %v1921_v20, %v1995_v27 }
 0x1eb   : > { %v1977_v7 = vsel %vm1946_vm5, %v1833_v23, %v1976_v36 }
 0x1ec   : > { %v1585_v51 = vpop.xlane.xlu1 %1584  ;;  %v1990_v39 = vsel %vm1944_vm4, %v1893_v50, %v1989_v40 }
 0x1ed   : > { %v1513_v61 = vpop.xlane.xlu0 %1512  ;;  %v1897_v3 = vrot.slane %v1585_v51, %v3226_v21  ;;  %v1861_v51 = vrot.slane %v3304_v24, %v3226_v21 }
 0x1ee   : > { %v1801_v53 = vrot.slane %v1513_v61, %v3226_v21 }
 0x1ef   : > { %v1991_v57 = vsel %vm1946_vm5, %v1897_v3, %v1990_v39 }
 0x1f0   : > { %v3310_v55 = vpop.xlane.xlu1 %1515  ;;  %v1970_v13 = vsel %vm1946_vm5, %v1801_v53, %v1969_v28 }
 0x1f1   : > { %v3312_v9 = vpop.xlane.xlu0 %1560  ;;  %v1805_v35 = vrot.slane %v3310_v55, %v3226_v21 }
 0x1f2   : > { %v1865_v58 = vrot.slane %v3312_v9, %v3226_v21  ;;  %v1982_v9 = vsel %vm1942_vm3, %v1857_v5, %v1981_v4 }
 0x1f3   : > { %v1971_v24 = vsel %vm1948_vm6, %v1805_v35, %v1970_v13  ;;  %v1983_v15 = vsel %vm1944_vm4, %v1861_v51, %v1982_v9 }
 0x1f4   : > { %v3314_v16 = vpop.xlane.xlu1 %1563  ;;  %v1984_v59 = vsel %vm1946_vm5, %v1865_v58, %v1983_v15 }
 0x1f5   : > { %v3318_v46 = vpop.xlane.xlu0 %1608  ;;  %v1869_v48 = vrot.slane %v3314_v16, %v3226_v21 }
 0x1f6   : > { %v1929_v23 = vrot.slane %v3318_v46, %v3226_v21 }
 0x1f7   : > { %v1985_v49 = vsel %vm1948_vm6, %v1869_v48, %v1984_v59 }
 0x1f8   : > { %v3325_v44 = vpop.xlane.xlu1 %1611 }
 0x1f9   : > { %v1540_v14 = vpop.xlane.xlu0 %1539  ;;  %v1933_v34 = vrot.slane %v3325_v44, %v3226_v21 }
 0x1fa   : > { %v1837_v30 = vrot.slane %v1540_v14, %v3226_v21  ;;  %v1997_v14 = vsel %vm1944_vm4, %v1925_v52, %v1996_v54 }
 0x1fb   : > { %v1998_v46 = vsel %vm1946_vm5, %v1929_v23, %v1997_v14 }
 0x1fc   : > { %v1543_v63 = vpop.xlane.xlu1 %1542  ;;  %v1978_v31 = vsel %vm1948_vm6, %v1837_v30, %v1977_v7  ;;  %v1999_v8 = vsel %vm1948_vm6, %v1933_v34, %v1998_v46 }
 0x1fd   : > { %v1841_v22 = vrot.slane %v1543_v63, %v3226_v21  ;;  %v1588_v45 = vpop.xlane.xlu0 %1587 }
 0x1fe   : > { %v1901_v0 = vrot.slane %v1588_v45, %v3226_v21 }
 0x1ff   : > { %v1979_v37 = vsel %vm1950_vm7, %v1841_v22, %v1978_v31 }
 0x200   : > { %2014 = vst.msk [vmem:[%s3245_s24 + $0x20] sm:$0xff] %vm2009_vm8, %v1979_v37  ;;  %v1591_v32 = vpop.xlane.xlu1 %1590  ;;  %v1992_v61 = vsel %vm1948_vm6, %v1901_v0, %v1991_v57 }
 0x201   : > { %v1905_v47 = vrot.slane %v1591_v32, %v3226_v21  ;;  %v1519_v55 = vpop.xlane.xlu0 %1518 }
 0x202   : > { %v1809_v26 = vrot.slane %v1519_v55, %v3226_v21 }
 0x203   : > { %v1993_v12 = vsel %vm1950_vm7, %v1905_v47, %v1992_v61 }
 0x204   : > { %2016 = vst.msk [vmem:[%s3245_s24 + $0x30] sm:$0xff] %vm2009_vm8, %v1993_v12  ;;  %v1972_v62 = vsel %vm1950_vm7, %v1809_v26, %v1971_v24 }
 0x205   : > { %2013 = vst.msk [vmem:[%s3245_s24 + $0x18] sm:$0xff] %vm2009_vm8, %v1972_v62  ;;  %v1567_v16 = vpop.xlane.xlu0 %1566 }
 0x206   : > { %v1873_v42 = vrot.slane %v1567_v16, %v3226_v21 }
 0x208   : > { %v1986_v19 = vsel %vm1950_vm7, %v1873_v42, %v1985_v49 }
 0x209   : > { %2015 = vst.msk [vmem:[%s3245_s24 + $0x28] sm:$0xff] %vm2009_vm8, %v1986_v19  ;;  %v1615_v41 = vpop.xlane.xlu0 %1614 }
 0x20a   : > { %v1937_v56 = vrot.slane %v1615_v41, %v3226_v21 }
 0x20c   : > { %v2000_v30 = vsel %vm1950_vm7, %v1937_v56, %v1999_v8 }
 0x20d   : > { %2017 = vst.msk [vmem:[%s3245_s24 + $0x38] sm:$0xff] %vm2009_vm8, %v2000_v30 }
 0x20e PF: > { %s11_s8 = sadd.s32 1, %s2162_s8   ;;  %s3542_s6 = smov %s2158_s7 }
 0x20f   : > { %p8_p5 = scmp.ge.s32.totalorder %s11_s8, 4   ;;  %s3543_s7 = smov %s3545_s9 }
 0x211   :  { %10 = sbr.rel (!%p8_p5) target bundleno = 2 (0x2), region = 54 }

</bundles_post_ra>
